<compile_context>
chip_gen: v5e
topology: v5e:2x2
jax: 0.10.0
libtpu: 0.0.40
codegen_flags: <defaults>
</compile_context>

<pallas_src>
import jax
import jax.numpy as jnp
from jax.experimental import pallas as pl
from jax.experimental.pallas import tpu as pltpu


# ---------------------------------------------------------------------------
# Helpers
# ---------------------------------------------------------------------------
def _cdiv(a: int, b: int) -> int:
    return -(-a // b)


def _vmem_capacity_bytes() -> int:
    """Physical VMEM of the attached TPU (fallback: 64 MiB, safe everywhere)."""
    try:
        return int(pltpu.get_tpu_info().vmem_capacity_bytes)
    except Exception:
        return 64 * 1024 * 1024


_TILE_CANDIDATES_MN = (1024, 768, 512, 384, 256, 128)
_TILE_CANDIDATES_K = (2048, 1536, 1024, 768, 512, 384, 256, 128)


def _pick_mn_tile(dim: int) -> int:
    """Largest candidate <= dim that minimizes padded work (cdiv(dim,c)*c)."""
    best = None
    for c in _TILE_CANDIDATES_MN:
        if c <= dim:
            key = (_cdiv(dim, c) * c, -c)
            if best is None or key < best[0]:
                best = (key, c)
    # Dim smaller than every candidate: full-extent block is always legal.
    return dim if best is None else best[1]


def _fits_vmem(tm: int, tn: int, tk: int, budget: int) -> bool:
    # Double-buffered f32 inputs + (conservatively) double-buffered output
    # + room for an f32 accumulator.
    bytes_needed = (2 * (tm * tk + tk * tn) + 3 * tm * tn) * 4
    return bytes_needed <= budget


# ---------------------------------------------------------------------------
# Kernel bodies
# ---------------------------------------------------------------------------
def _mm_single_kernel(a_ref, b_ref, o_ref):
    # Full-K block: one MXU pass per (i, j) output tile, no reduction loop.
    o_ref[...] = jnp.dot(
        a_ref[...], b_ref[...], preferred_element_type=jnp.float32
    ).astype(o_ref.dtype)


def _mm_reduce_f32_kernel(a_ref, b_ref, o_ref):
    # K split across grid axis 2; out BlockSpec is k-invariant so the f32
    # output tile stays resident in VMEM -> accumulate in place.
    @pl.when(pl.program_id(2) == 0)
    def _():
        o_ref[...] = jnp.zeros_like(o_ref)

    o_ref[...] += jnp.dot(
        a_ref[...], b_ref[...], preferred_element_type=jnp.float32
    )


def _mm_reduce_acc_kernel(a_ref, b_ref, o_ref, acc_ref):
    # Low-precision output dtype: accumulate in an f32 scratch, cast at the end.
    @pl.when(pl.program_id(2) == 0)
    def _():
        acc_ref[...] = jnp.zeros_like(acc_ref)

    acc_ref[...] += jnp.dot(
        a_ref[...], b_ref[...], preferred_element_type=jnp.float32
    )

    @pl.when(pl.program_id(2) == pl.num_programs(2) - 1)
    def _():
        o_ref[...] = acc_ref[...].astype(o_ref.dtype)


# ---------------------------------------------------------------------------
# Wrapper
# ---------------------------------------------------------------------------
def matmul(a: jax.Array, b: jax.Array, *, max_k_block: int | None = None) -> jax.Array:
    """C = A @ B with A:(M,K), B:(K,N), via a tiled Pallas TPU kernel."""
    M, K = a.shape
    K2, N = b.shape
    assert K == K2, "inner dimensions must match"
    out_dtype = a.dtype

    # Generation-aware VMEM budget.
    capacity = _vmem_capacity_bytes()
    vmem_limit = min(capacity * 3 // 4, 100 * 1024 * 1024)
    budget = max(vmem_limit - 4 * 1024 * 1024, 8 * 1024 * 1024)

    # Maximize output tile (tm, tn) first: HBM bytes scale with refetch counts.
    tm = _pick_mn_tile(M)
    tn = _pick_mn_tile(N)

    # Keep at least two blocks along a parallel axis so a 2-TensorCore chip
    # (v7x megacore) can shard the grid; negligible cost on 1-TC chips.
    if _cdiv(M, tm) * _cdiv(N, tn) < 2:
        if tm >= 256:
            tm //= 2
        elif tn >= 256:
            tn //= 2

    # Safety: shrink tm/tn until at least the smallest K tile fits the budget.
    while not _fits_vmem(tm, tn, min(K, 128), budget) and max(tm, tn) > 128:
        if tm >= tn:
            tm = max(tm // 2, 128)
        else:
            tn = max(tn // 2, 128)

    # Reduction tile: prefer the whole K in one block (no reduction grid axis).
    k_cap = K if max_k_block is None else min(K, max_k_block)
    tk = None
    if k_cap == K and _fits_vmem(tm, tn, K, budget):
        tk = K
    else:
        for c in _TILE_CANDIDATES_K:
            if c <= k_cap and _fits_vmem(tm, tn, c, budget):
                tk = c
                break
        if tk is None:
            tk = min(k_cap, 128)

    gm, gn = _cdiv(M, tm), _cdiv(N, tn)

    cost = pl.CostEstimate(
        flops=2 * M * N * K,
        transcendentals=0,
        # Include the tiled refetch factor: A re-read per N-tile, B per M-tile.
        bytes_accessed=4 * (M * K * gn + K * N * gm + M * N),
    )

    if tk == K:
        # Single-pass path: 2-D grid, no accumulator, no pl.when.
        compiler_params = pltpu.CompilerParams(
            dimension_semantics=("parallel", "parallel"),
            vmem_limit_bytes=vmem_limit,
        )
        grid_spec = pltpu.PrefetchScalarGridSpec(
            num_scalar_prefetch=0,
            grid=(gm, gn),
            in_specs=[
                pl.BlockSpec((tm, K), lambda i, j: (i, 0)),
                pl.BlockSpec((K, tn), lambda i, j: (0, j)),
            ],
            out_specs=pl.BlockSpec((tm, tn), lambda i, j: (i, j)),
        )
        return pl.pallas_call(
            _mm_single_kernel,
            out_shape=jax.ShapeDtypeStruct((M, N), out_dtype),
            grid_spec=grid_spec,
            compiler_params=compiler_params,
            cost_estimate=cost,
        )(a, b)

    # Reduce path: zero-pad K so the reduction axis divides exactly
    # (zero padding is numerically exact for a matmul).
    gk = _cdiv(K, tk)
    Kp = gk * tk
    if Kp != K:
        a = jnp.pad(a, ((0, 0), (0, Kp - K)))
        b = jnp.pad(b, ((0, Kp - K), (0, 0)))

    use_f32_inplace = out_dtype == jnp.float32
    kernel = _mm_reduce_f32_kernel if use_f32_inplace else _mm_reduce_acc_kernel
    scratch = [] if use_f32_inplace else [pltpu.VMEM((tm, tn), jnp.float32)]

    compiler_params = pltpu.CompilerParams(
        dimension_semantics=("parallel", "parallel", "arbitrary"),
        vmem_limit_bytes=vmem_limit,
    )
    grid_spec = pltpu.PrefetchScalarGridSpec(
        num_scalar_prefetch=0,
        grid=(gm, gn, gk),
        in_specs=[
            pl.BlockSpec((tm, tk), lambda i, j, k: (i, k)),
            pl.BlockSpec((tk, tn), lambda i, j, k: (k, j)),
        ],
        out_specs=pl.BlockSpec((tm, tn), lambda i, j, k: (i, j)),
        scratch_shapes=scratch,
    )
    return pl.pallas_call(
        kernel,
        out_shape=jax.ShapeDtypeStruct((M, N), out_dtype),
        grid_spec=grid_spec,
        compiler_params=compiler_params,
        cost_estimate=cost,
    )(a, b)


# ---------------------------------------------------------------------------
# Driver
# ---------------------------------------------------------------------------
def _check(c, a, b, name):
    ref = jnp.dot(a, b, preferred_element_type=jnp.float32)
    assert c.shape == ref.shape, f"{name}: shape mismatch {c.shape} vs {ref.shape}"
    err = float(jnp.max(jnp.abs(c - ref)))
    scale = float(jnp.max(jnp.abs(ref))) + 1.0
    assert err / scale < 2e-3, f"{name}: max err {err} vs scale {scale}"


if __name__ == "__main__":
    key = jax.random.PRNGKey(0)
    k_a, k_b, k_c, k_d = jax.random.split(key, 4)

    # 1) Small divisible shape: single-pass path; grid split so two parallel
    #    blocks exist (megacore on v7x).
    M, K, N = 256, 128, 256
    A = jax.random.normal(k_a, (M, K), dtype=jnp.float32)
    B = jax.random.normal(k_b, (K, N), dtype=jnp.float32)
    C = jax.block_until_ready(matmul(A, B))
    _check(C, A, B, "divisible/single-pass")

    # 2) Non-divisible shape: cdiv grid with partial edge blocks, full-K block.
    M2, K2, N2 = 300, 200, 260
    A2 = jax.random.normal(k_c, (M2, K2), dtype=jnp.float32)
    B2 = jax.random.normal(k_d, (K2, N2), dtype=jnp.float32)
    C2 = jax.block_until_ready(matmul(A2, B2))
    _check(C2, A2, B2, "non-divisible/single-pass")

    # 3) Forced K-reduction path with a non-multiple K (zero-padded reduce).
    M3, K3, N3 = 128, 500, 128
    A3 = jax.random.normal(k_a, (M3, K3), dtype=jnp.float32)
    B3 = jax.random.normal(k_b, (K3, N3), dtype=jnp.float32)
    C3 = jax.block_until_ready(matmul(A3, B3, max_k_block=128))
    _check(C3, A3, B3, "reduce-path")

    print("KERNEL_OK")
</pallas_src>

<mosaic_0001>
module attributes {stable_mosaic.version = 11 : i64} {
  func.func @_mm_single_kernel(%arg0: i32, %arg1: i32, %arg2: memref<128x128xf32, #tpu.memory_space<vmem>>, %arg3: memref<128x256xf32, #tpu.memory_space<vmem>>, %arg4: memref<128x256xf32, #tpu.memory_space<vmem>>) attributes {dimension_semantics = [#tpu.dimension_semantics<parallel>, #tpu.dimension_semantics<parallel>], iteration_bounds = array<i64: 2, 1>, scalar_prefetch = 0 : i64, scratch_operands = 0 : i64, tpu.core_type = #tpu.core_type<tc>, window_params = [{transform_indices = @transform_0, window_bounds = array<i64: 128, 128>}, {transform_indices = @transform_1, window_bounds = array<i64: 128, 256>}, {transform_indices = @transform_2, window_bounds = array<i64: 128, 256>}]} {
    %c0 = arith.constant 0 : index
    %c0_0 = arith.constant 0 : index
    %0 = vector.load %arg2[%c0, %c0_0] : memref<128x128xf32, #tpu.memory_space<vmem>>, vector<128x128xf32>
    %c0_1 = arith.constant 0 : index
    %c0_2 = arith.constant 0 : index
    %1 = vector.load %arg3[%c0_1, %c0_2] : memref<128x256xf32, #tpu.memory_space<vmem>>, vector<128x256xf32>
    %cst = arith.constant dense<0.000000e+00> : vector<128x256xf32>
    %2 = tpu.matmul %0, %1, %cst {dimension_numbers = #tpu.dot_dimension_numbers<[1], [0], [0], [1], [0, 0, 1, 1], [], []>} : vector<128x128xf32>, vector<128x256xf32>, vector<128x256xf32> -> vector<128x256xf32>
    %c0_3 = arith.constant 0 : index
    %c0_4 = arith.constant 0 : index
    %3 = vector.load %arg4[%c0_3, %c0_4] : memref<128x256xf32, #tpu.memory_space<vmem>>, vector<128x256xf32>
    tpu.vector_store %arg4[%c0_3, %c0_4], %2 {strides = array<i32>} : memref<128x256xf32, #tpu.memory_space<vmem>>, vector<128x256xf32>,
    return
  }
  func.func @transform_0(%arg0: i32, %arg1: i32) -> (i32, i32) {
    %c0_i32 = arith.constant 0 : i32
    %c0_i32_0 = arith.constant 0 : i32
    return %arg0, %c0_i32 : i32, i32
  }
  func.func @transform_1(%arg0: i32, %arg1: i32) -> (i32, i32) {
    %c0_i32 = arith.constant 0 : i32
    %c0_i32_0 = arith.constant 0 : i32
    return %c0_i32, %arg1 : i32, i32
  }
  func.func @transform_2(%arg0: i32, %arg1: i32) -> (i32, i32) {
    %c0_i32 = arith.constant 0 : i32
    return %arg0, %arg1 : i32, i32
  }
}

</mosaic_0001>

<bundles_post_ra>
// kernel: tpu_custom_call.1
= control target key start
LH: loop header
LB: loop body
LE: loop exit
PB: predicated region body
PF: predicated region fallthrough
CT: control target
= control target key end

     0   :  { %7 = vsyncpa [#allocation3], 0  ;;  %s1037_s0 = inlined_call_operand.hbm [shape: f32[256,128], index: 0, kind: input, shape index: {}]   ;;  %s1038_s1 = inlined_call_operand.hbm [shape: f32[128,256], index: 1, kind: input, shape index: {}]   ;;  %s1039_s2 = inlined_call_operand.hbm [shape: f32[256,256], index: 2, kind: output, shape index: {}]  }
   0x1   :  { %9 = vsyncpa [#allocation3 + $0x1], 0 }
   0x2   :  { %10 = vsyncpa [#allocation6], 0 }
   0x3   :  { %11 = vsyncpa [#allocation4], 0 }
   0x4   :  { %13 = vsyncpa [#allocation4 + $0x1], 0  ;;  %s834_s9 = smov 0   ;;  %s836_s10 = smov 0  }
   0x5   :  { %s838_s11 = smov 0   ;;  %s840_s12 = smov 0  }
   0x6   :  { %s842_s13 = smov 0   ;;  %s844_s14 = smov 0  }
   0x7 LB: > { %s532_s15 = sadd.s32 4294967295, %s810_s14   ;;  %s533_s16 = sadd.s32 4294967294, %s810_s14   ;;  %s810_s14 = sphi %s844_s14, %s19_s14   ;;  %s806_s13 = sphi %s842_s13, %s1051_s13   ;;  %s802_s12 = sphi %s840_s12, %s1050_s12   ;;  %s798_s11 = sphi %s838_s11, %s1049_s11   ;;  %s794_s10 = sphi %s836_s10, %s1048_s10   ;;  %s790_s9 = sphi %s834_s9, %s1047_s9  }
   0x8   : > { %p51_p0 = scmp.ne.s32.totalorder %s794_s10, %s790_s9  ;;  %p868_p1 = scmp.eq.s32.totalorder %s532_s15, 0 }
   0x9   : > { %p872_p2 = scmp.eq.s32.totalorder %s532_s15, 1  ;;  %p109_p3 = scmp.eq.s32.totalorder %s533_s16, 1 }
   0xa   : > { %p878_p4 = por %p868_p1, %p51_p0  ;;  %p534_p5 = scmp.ge.s32.totalorder %s810_s14, 1 }
   0xb   : > { %p883_p6 = por %p109_p3, %p51_p0  ;;  %p116_p7 = scmp.lt.s32.totalorder %s810_s14, 3 }
   0xc   : > { %s130_s23 = sshll.u32 %s1038_s1, 4  ;;  %s812_s25 = smov [#allocation5]   ;;  %s131_s23 = int_to_ptr.hbm [resolvable:$true] %s130_s23 }
   0xd   : > { %p891_p8 = pnand %p534_p5, %p116_p7  ;;  %s132_s26 = sshll.u32 %s812_s25, 4  ;;  %s133_s26 = int_to_ptr.vmem [resolvable:$true] %s132_s26 }
   0xe   : > { %p536_p11 = scmp.ge.s32.totalorder %s810_s14, 2  ;;  %s813_s27 = smov 256  }
   0xf   : > { %p593_p9 = pneg %p891_p8  ;;  %s814_s28 = smov 16  }
  0x10   : > { %s31_s29 = sadd.s32 1, %s806_s13  ;;  %s38_s30 = sadd.s32 1, %s798_s11 }
  0x11   : > { %p594_p10 = pnand %p593_p9, %p868_p1  ;;  %p33_p12 = scmp.ge.s32.totalorder %s31_s29, 2 }
  0x12   : > { %p45_p13 = scmp.ne.s32.totalorder %s798_s11, %s794_s10  ;;  %p46_p0 = scmp.eq.s32.totalorder %s810_s14, 0 }
  0x13   : > { %596 = dma.hbm_to_vmem [thread:$0]  (!%p594_p10), %s131_s23, 4096, %s133_s26, [#allocation6], %s813_s27, %s813_s27, %s814_s28  }
  0x14   : > { %s1053_s29 = smov (%p33_p12, %s31_s29), 0  ;;  %p907_p3 = por %p46_p0, %p45_p13 }
  0x15   : > { %p913_p5 = por %p872_p2, %p45_p13  ;;  %s35_s5 = ssub.s32 %s806_s13, %s1053_s29 }
  0x16   : > { %p606_p7 = scmp.lt.s32.totalorder %s810_s14, 2  ;;  %p36_p9 = scmp.eq.s32.totalorder %s35_s5, 0 }
  0x17   : > { %s146_s6 = sand.u32 1, %s798_s11   ;;  %s550_s15 = sshll.u32 %s806_s13, 7 }
  0x18   : > { %s537_s7 = sshll.u32 %s146_s6, 7  ;;  %s155_s22 = scalar_lea.hbm %s1037_s0, %s550_s15 }
  0x19   : > { %s922_s8 = scalar_select %p36_p9, %s798_s11, %s38_s30  }
  0x1a   : > { %s150_s23 = scalar_lea.vmem [#allocation2], %s537_s7  ;;  %s156_s18 = sshll.u32 %s155_s22, 4  ;;  %s157_s18 = int_to_ptr.hbm [resolvable:$true] %s156_s18 }
  0x1b   : > { %s158_s25 = sshll.u32 %s150_s23, 4  ;;  %p598_p2 = pnand %p606_p7, %p907_p3  ;;  %s159_s25 = int_to_ptr.vmem [resolvable:$true] %s158_s25 }
  0x1c   : > { %s147_s26 = scalar_lea.sflag [#allocation3], %s146_s6  ;;  %s815_s27 = smov 128  }
  0x1d   : > { %s816_s28 = smov 8   ;;  %170 = sbr.rel (%p891_p8) target bundleno = 262 (0x106), region = 28 }
  0x1e   : > { %600 = dma.hbm_to_vmem [thread:$0]  (!%p598_p2), %s157_s18, 2048, %s159_s25, %s147_s26, %s815_s27, %s815_s27, %s816_s28  }
  0x1f   : > { %s933_s30 = sand.u32 (!%p891_p8), 1, %s794_s10  }
  0x20   : > { %s541_s5 = sshll.u32 (!%p891_p8), %s933_s30, 7  ;;  %s173_s7 = scalar_lea.sflag (!%p891_p8), [#allocation3], %s933_s30 }
  0x21   : > { %s937_s15 = scalar_lea.vmem (!%p891_p8), [#allocation2], %s541_s5 }
  0x22   : > { %777 = dma.done.wait (%p878_p4), %s173_s7, 2048  }
  0x23   : > { %779 = vsyncadd (%p878_p4), %s173_s7, 4294965248 }
  0x24   : > { %781 = dma.done.wait (%p868_p1), [#allocation6], 4096  }
  0x25   : > { %783 = vsyncadd (%p868_p1), [#allocation6], 4294963200  ;;  %v253_v0 = vld [vmem:[#allocation5 + $0xf0] sm:$0xff]  ;;  %v254_v1 = vld [vmem:[#allocation5 + $0xf8] sm:$0xff]  ;;  %s543_s17 = sshll.u32 %s933_s30, 8  ;;  %s552_s24 = sshll.u32 %s802_s12, 8 }
  0x26   : > { %v251_v2 = vld [vmem:[#allocation5 + $0xe0] sm:$0xff]  ;;  %553 = vmatpush.msra.mxu2 %v253_v0  ;;  %569 = vmatpush.msra.mxu3 %v254_v1  ;;  %v252_v3 = vld [vmem:[#allocation5 + $0xe8] sm:$0xff]  ;;  %v249_v4 = vld [vmem:[#allocation5 + $0xd0] sm:$0xff]  ;;  %s964_s19 = scalar_lea.vmem [#allocation7], %s543_s17  ;;  %s432_s16 = scalar_lea.hbm %s1039_s2, %s552_s24 }
  0x27   : > { %v250_v5 = vld [vmem:[#allocation5 + $0xd8] sm:$0xff]  ;;  %255 = vmatpush.msra.mxu0 %v253_v0  ;;  %320 = vmatpush.msra.mxu1 %v254_v1  ;;  %v247_v6 = vld [vmem:[#allocation5 + $0xc0] sm:$0xff]  ;;  %v248_v7 = vld [vmem:[#allocation5 + $0xc8] sm:$0xff]  ;;  %s433_s21 = sshll.u32 %s964_s19, 4  ;;  %s435_s22 = sshll.u32 %s432_s16, 4  ;;  %s434_s21 = int_to_ptr.vmem [resolvable:$true] %s433_s21  ;;  %s436_s22 = int_to_ptr.hbm [resolvable:$true] %s435_s22 }
  0x28   : > { %554 = vmatpush.msra.mxu2 %v251_v2  ;;  %570 = vmatpush.msra.mxu3 %v252_v3  ;;  %v245_v8 = vld [vmem:[#allocation5 + $0xb0] sm:$0xff]  ;;  %v246_v9 = vld [vmem:[#allocation5 + $0xb8] sm:$0xff]  ;;  %v243_v10 = vld [vmem:[#allocation5 + $0xa0] sm:$0xff]  ;;  %s418_s12 = scalar_lea.sflag [#allocation4], %s933_s30  ;;  %s738_s23 = sshra.s32 %s436_s22, 4  ;;  %s739_s23 = int_to_ptr.hbm [resolvable:$true] %s738_s23 }
  0x29   : > { %256 = vmatpush.msra.mxu0 %v251_v2  ;;  %321 = vmatpush.msra.mxu1 %v252_v3  ;;  %v244_v11 = vld [vmem:[#allocation5 + $0xa8] sm:$0xff]  ;;  %v241_v12 = vld [vmem:[#allocation5 + $0x90] sm:$0xff]  ;;  %v242_v13 = vld [vmem:[#allocation5 + $0x98] sm:$0xff]  ;;  %s740_s25 = scalar_lea.hbm %s739_s23, 256  ;;  %s744_s27 = scalar_lea.hbm %s1039_s2, 512 }
  0x2a   : > { %555 = vmatpush.msra.mxu2 %v249_v4  ;;  %571 = vmatpush.msra.mxu3 %v250_v5  ;;  %v239_v14 = vld [vmem:[#allocation5 + $0x80] sm:$0xff]  ;;  %v240_v15 = vld [vmem:[#allocation5 + $0x88] sm:$0xff]  ;;  %v237_v16 = vld [vmem:[#allocation5 + $0x70] sm:$0xff]  ;;  %p741_p1 = scmp.ne.s32.totalorder %s739_s23, %s740_s25  ;;  %p745_p10 = scmp.lt.s32.totalorder %s739_s23, %s1039_s2 }
  0x2b   : > { %257 = vmatpush.msra.mxu0 %v249_v4  ;;  %322 = vmatpush.msra.mxu1 %v250_v5  ;;  %v238_v17 = vld [vmem:[#allocation5 + $0x78] sm:$0xff]  ;;  %v235_v18 = vld [vmem:[#allocation5 + $0x60] sm:$0xff]  ;;  %v236_v19 = vld [vmem:[#allocation5 + $0x68] sm:$0xff]  ;;  %p746_p12 = scmp.lt.s32.totalorder %s744_s27, %s740_s25 }
  0x2c   : > { %556 = vmatpush.msra.mxu2 %v247_v6  ;;  %572 = vmatpush.msra.mxu3 %v248_v7  ;;  %v233_v20 = vld [vmem:[#allocation5 + $0x50] sm:$0xff]  ;;  %v234_v21 = vld [vmem:[#allocation5 + $0x58] sm:$0xff]  ;;  %v231_v22 = vld [vmem:[#allocation5 + $0x40] sm:$0xff]  ;;  %p742_p4 = pnand %p741_p1, %p913_p5 }
  0x2d   : > { %258 = vmatpush.msra.mxu0 %v247_v6  ;;  %323 = vmatpush.msra.mxu1 %v248_v7  ;;  %v232_v23 = vld [vmem:[#allocation5 + $0x48] sm:$0xff]  ;;  %v229_v24 = vld [vmem:[#allocation5 + $0x30] sm:$0xff]  ;;  %v230_v25 = vld [vmem:[#allocation5 + $0x38] sm:$0xff]  ;;  %p747_p13 = por %p746_p12, %p745_p10 }
  0x2e   : > { %557 = vmatpush.msra.mxu2 %v245_v8  ;;  %573 = vmatpush.msra.mxu3 %v246_v9  ;;  %v227_v26 = vld [vmem:[#allocation5 + $0x20] sm:$0xff]  ;;  %v228_v27 = vld [vmem:[#allocation5 + $0x28] sm:$0xff]  ;;  %v225_v28 = vld [vmem:[#allocation5 + $0x10] sm:$0xff]  ;;  %p743_p8 = pneg %p742_p4 }
  0x2f   : > { %259 = vmatpush.msra.mxu0 %v245_v8  ;;  %324 = vmatpush.msra.mxu1 %v246_v9  ;;  %v226_v29 = vld [vmem:[#allocation5 + $0x18] sm:$0xff]  ;;  %v223_v30 = vld [vmem:[#allocation5] sm:$0xff]  ;;  %v224_v31 = vld [vmem:[#allocation5 + $0x8] sm:$0xff] }
  0x30   : > { %558 = vmatpush.msra.mxu2 %v243_v10  ;;  %574 = vmatpush.msra.mxu3 %v244_v11  ;;  %v215_v32 = vld [vmem:[%s937_s15 + $0x40] sm:$0xff]  ;;  %v216_v34 = vld [vmem:[%s937_s15 + $0x48] sm:$0xff]  ;;  %v217_v36 = vld [vmem:[%s937_s15 + $0x50] sm:$0xff]  ;;  %p748_p0 = pnand %p747_p13, %p743_p8 }
  0x31   : > { %260 = vmatpush.msra.mxu0 %v243_v10  ;;  %325 = vmatpush.msra.mxu1 %v244_v11  ;;  %v207_v33 = vld [vmem:[%s937_s15] sm:$0xff]  ;;  %v208_v35 = vld [vmem:[%s937_s15 + $0x8] sm:$0xff]  ;;  %v209_v37 = vld [vmem:[%s937_s15 + $0x10] sm:$0xff] }
  0x32   : > { %559 = vmatpush.msra.mxu2 %v241_v12  ;;  %575 = vmatpush.msra.mxu3 %v242_v13  ;;  %v218_v38 = vld [vmem:[%s937_s15 + $0x58] sm:$0xff]  ;;  %v219_v40 = vld [vmem:[%s937_s15 + $0x60] sm:$0xff]  ;;  %v220_v42 = vld [vmem:[%s937_s15 + $0x68] sm:$0xff] }
  0x33   : > { %261 = vmatpush.msra.mxu0 %v241_v12  ;;  %326 = vmatpush.msra.mxu1 %v242_v13  ;;  %v210_v39 = vld [vmem:[%s937_s15 + $0x18] sm:$0xff]  ;;  %v211_v41 = vld [vmem:[%s937_s15 + $0x20] sm:$0xff]  ;;  %v212_v43 = vld [vmem:[%s937_s15 + $0x28] sm:$0xff] }
  0x34   : > { %560 = vmatpush.msra.mxu2 %v239_v14  ;;  %576 = vmatpush.msra.mxu3 %v240_v15  ;;  %v221_v44 = vld [vmem:[%s937_s15 + $0x70] sm:$0xff]  ;;  %v222_v46 = vld [vmem:[%s937_s15 + $0x78] sm:$0xff] }
  0x35   : > { %262 = vmatpush.msra.mxu0 %v239_v14  ;;  %327 = vmatpush.msra.mxu1 %v240_v15  ;;  %v213_v45 = vld [vmem:[%s937_s15 + $0x30] sm:$0xff]  ;;  %v214_v47 = vld [vmem:[%s937_s15 + $0x38] sm:$0xff] }
  0x36   : > { %561 = vmatpush.msra.mxu2 %v237_v16  ;;  %577 = vmatpush.msra.mxu3 %v238_v17 }
  0x37   : > { %263 = vmatpush.msra.mxu0 %v237_v16  ;;  %328 = vmatpush.msra.mxu1 %v238_v17 }
  0x38   : > { %562 = vmatpush.msra.mxu2 %v235_v18  ;;  %578 = vmatpush.msra.mxu3 %v236_v19 }
  0x39   : > { %264 = vmatpush.msra.mxu0 %v235_v18  ;;  %329 = vmatpush.msra.mxu1 %v236_v19 }
  0x3a   : > { %563 = vmatpush.msra.mxu2 %v233_v20  ;;  %579 = vmatpush.msra.mxu3 %v234_v21 }
  0x3b   : > { %265 = vmatpush.msra.mxu0 %v233_v20  ;;  %330 = vmatpush.msra.mxu1 %v234_v21 }
  0x3c   : > { %564 = vmatpush.msra.mxu2 %v231_v22  ;;  %580 = vmatpush.msra.mxu3 %v232_v23 }
  0x3d   : > { %266 = vmatpush.msra.mxu0 %v231_v22  ;;  %331 = vmatpush.msra.mxu1 %v232_v23 }
  0x3e   : > { %565 = vmatpush.msra.mxu2 %v229_v24  ;;  %581 = vmatpush.msra.mxu3 %v230_v25 }
  0x3f   : > { %267 = vmatpush.msra.mxu0 %v229_v24  ;;  %332 = vmatpush.msra.mxu1 %v230_v25 }
  0x40   : > { %566 = vmatpush.msra.mxu2 %v227_v26  ;;  %582 = vmatpush.msra.mxu3 %v228_v27 }
  0x41   : > { %268 = vmatpush.msra.mxu0 %v227_v26  ;;  %333 = vmatpush.msra.mxu1 %v228_v27 }
  0x42   : > { %567 = vmatpush.msra.mxu2 %v225_v28  ;;  %583 = vmatpush.msra.mxu3 %v226_v29 }
  0x43   : > { %269 = vmatpush.msra.mxu0 %v225_v28  ;;  %334 = vmatpush.msra.mxu1 %v226_v29 }
  0x44   : > { %568 = vmatpush.msra.mxu2 %v223_v30  ;;  %584 = vmatpush.msra.mxu3 %v224_v31 }
  0x45   : > { %295 = vmatmul.f32.vlgmr.msra.gmra.mxu2 %v215_v32  ;;  %360 = vmatmul.f32.vlgmr.msra.gmra.mxu3 %v215_v32 }
  0x46   : > { %270 = vmatpush.msra.mxu0 %v223_v30  ;;  %335 = vmatpush.msra.mxu1 %v224_v31 }
  0x47   : > { %271 = vmatmul.f32.vlgmr.msra.gmra.mxu0 %v207_v33  ;;  %336 = vmatmul.f32.vlgmr.msra.gmra.mxu1 %v207_v33 }
  0x4d   : > { %298 = vmatmul.f32.gmra.mxu2 %v216_v34  ;;  %363 = vmatmul.f32.gmra.mxu3 %v216_v34 }
  0x4f   : > { %274 = vmatmul.f32.gmra.mxu0 %v208_v35  ;;  %339 = vmatmul.f32.gmra.mxu1 %v208_v35 }
  0x55   : > { %301 = vmatmul.f32.gmra.mxu2 %v217_v36  ;;  %366 = vmatmul.f32.gmra.mxu3 %v217_v36 }
  0x57   : > { %277 = vmatmul.f32.gmra.mxu0 %v209_v37  ;;  %342 = vmatmul.f32.gmra.mxu1 %v209_v37 }
  0x5d   : > { %304 = vmatmul.f32.gmra.mxu2 %v218_v38  ;;  %369 = vmatmul.f32.gmra.mxu3 %v218_v38 }
  0x5f   : > { %280 = vmatmul.f32.gmra.mxu0 %v210_v39  ;;  %345 = vmatmul.f32.gmra.mxu1 %v210_v39 }
  0x65   : > { %307 = vmatmul.f32.gmra.mxu2 %v219_v40  ;;  %372 = vmatmul.f32.gmra.mxu3 %v219_v40 }
  0x67   : > { %283 = vmatmul.f32.gmra.mxu0 %v211_v41  ;;  %348 = vmatmul.f32.gmra.mxu1 %v211_v41 }
  0x6d   : > { %310 = vmatmul.f32.gmra.mxu2 %v220_v42  ;;  %375 = vmatmul.f32.gmra.mxu3 %v220_v42 }
  0x6f   : > { %286 = vmatmul.f32.gmra.mxu0 %v212_v43  ;;  %351 = vmatmul.f32.gmra.mxu1 %v212_v43 }
  0x75   : > { %313 = vmatmul.f32.gmra.mxu2 %v221_v44  ;;  %378 = vmatmul.f32.gmra.mxu3 %v221_v44 }
  0x77   : > { %289 = vmatmul.f32.gmra.mxu0 %v213_v45  ;;  %354 = vmatmul.f32.gmra.mxu1 %v213_v45 }
  0x7d   : > { %316 = vmatmul.f32.gmra.mxu2 %v222_v46  ;;  %381 = vmatmul.f32.gmra.mxu3 %v222_v46 }
  0x7f   : > { %292 = vmatmul.f32.gmra.mxu0 %v214_v47  ;;  %357 = vmatmul.f32.gmra.mxu1 %v214_v47 }
  0xc4   : > { %v272_v48 = vpop.f32.mrf.mxu0  ;;  %v337_v49 = vpop.f32.mrf.mxu1 }
  0xc5   : > { %385 = vst [vmem:[%s964_s19] sm:$0xff] %v272_v48 }
  0xc6   : > { %386 = vst [vmem:[%s964_s19 + $0x8] sm:$0xff] %v337_v49 }
  0xc8   : > { %v296_v50 = vpop.f32.mrf.mxu2  ;;  %v361_v51 = vpop.f32.mrf.mxu3 }
  0xc9   : > { %401 = vst [vmem:[%s964_s19 + $0x80] sm:$0xff] %v296_v50 }
  0xca   : > { %402 = vst [vmem:[%s964_s19 + $0x88] sm:$0xff] %v361_v51 }
  0xcc   : > { %v275_v52 = vpop.f32.mrf.mxu0  ;;  %v340_v53 = vpop.f32.mrf.mxu1 }
  0xcd   : > { %387 = vst [vmem:[%s964_s19 + $0x10] sm:$0xff] %v275_v52 }
  0xce   : > { %388 = vst [vmem:[%s964_s19 + $0x18] sm:$0xff] %v340_v53 }
  0xd0   : > { %v299_v54 = vpop.f32.mrf.mxu2  ;;  %v364_v55 = vpop.f32.mrf.mxu3 }
  0xd1   : > { %403 = vst [vmem:[%s964_s19 + $0x90] sm:$0xff] %v299_v54 }
  0xd2   : > { %404 = vst [vmem:[%s964_s19 + $0x98] sm:$0xff] %v364_v55 }
  0xd4   : > { %v278_v56 = vpop.f32.mrf.mxu0  ;;  %v343_v57 = vpop.f32.mrf.mxu1 }
  0xd5   : > { %389 = vst [vmem:[%s964_s19 + $0x20] sm:$0xff] %v278_v56 }
  0xd6   : > { %390 = vst [vmem:[%s964_s19 + $0x28] sm:$0xff] %v343_v57 }
  0xd8   : > { %v302_v58 = vpop.f32.mrf.mxu2  ;;  %v367_v59 = vpop.f32.mrf.mxu3 }
  0xd9   : > { %405 = vst [vmem:[%s964_s19 + $0xa0] sm:$0xff] %v302_v58 }
  0xda   : > { %406 = vst [vmem:[%s964_s19 + $0xa8] sm:$0xff] %v367_v59 }
  0xdc   : > { %v281_v60 = vpop.f32.mrf.mxu0  ;;  %v346_v61 = vpop.f32.mrf.mxu1 }
  0xdd   : > { %391 = vst [vmem:[%s964_s19 + $0x30] sm:$0xff] %v281_v60 }
  0xde   : > { %392 = vst [vmem:[%s964_s19 + $0x38] sm:$0xff] %v346_v61 }
  0xe0   : > { %v305_v62 = vpop.f32.mrf.mxu2  ;;  %v370_v63 = vpop.f32.mrf.mxu3 }
  0xe1   : > { %407 = vst [vmem:[%s964_s19 + $0xb0] sm:$0xff] %v305_v62 }
  0xe2   : > { %408 = vst [vmem:[%s964_s19 + $0xb8] sm:$0xff] %v370_v63 }
  0xe4   : > { %v284_v0 = vpop.f32.mrf.mxu0  ;;  %v349_v1 = vpop.f32.mrf.mxu1 }
  0xe5   : > { %393 = vst [vmem:[%s964_s19 + $0x40] sm:$0xff] %v284_v0 }
  0xe6   : > { %394 = vst [vmem:[%s964_s19 + $0x48] sm:$0xff] %v349_v1 }
  0xe8   : > { %v308_v2 = vpop.f32.mrf.mxu2  ;;  %v373_v3 = vpop.f32.mrf.mxu3 }
  0xe9   : > { %409 = vst [vmem:[%s964_s19 + $0xc0] sm:$0xff] %v308_v2 }
  0xea   : > { %410 = vst [vmem:[%s964_s19 + $0xc8] sm:$0xff] %v373_v3 }
  0xec   : > { %v287_v4 = vpop.f32.mrf.mxu0  ;;  %v352_v5 = vpop.f32.mrf.mxu1 }
  0xed   : > { %395 = vst [vmem:[%s964_s19 + $0x50] sm:$0xff] %v287_v4 }
  0xee   : > { %396 = vst [vmem:[%s964_s19 + $0x58] sm:$0xff] %v352_v5 }
  0xf0   : > { %v311_v6 = vpop.f32.mrf.mxu2  ;;  %v376_v7 = vpop.f32.mrf.mxu3 }
  0xf1   : > { %411 = vst [vmem:[%s964_s19 + $0xd0] sm:$0xff] %v311_v6 }
  0xf2   : > { %412 = vst [vmem:[%s964_s19 + $0xd8] sm:$0xff] %v376_v7 }
  0xf4   : > { %v290_v8 = vpop.f32.mrf.mxu0  ;;  %v355_v9 = vpop.f32.mrf.mxu1 }
  0xf5   : > { %397 = vst [vmem:[%s964_s19 + $0x60] sm:$0xff] %v290_v8 }
  0xf6   : > { %398 = vst [vmem:[%s964_s19 + $0x68] sm:$0xff] %v355_v9 }
  0xf8   : > { %v314_v10 = vpop.f32.mrf.mxu2  ;;  %v379_v11 = vpop.f32.mrf.mxu3 }
  0xf9   : > { %413 = vst [vmem:[%s964_s19 + $0xe0] sm:$0xff] %v314_v10 }
  0xfa   : > { %414 = vst [vmem:[%s964_s19 + $0xe8] sm:$0xff] %v379_v11 }
  0xfc   : > { %v293_v12 = vpop.f32.mrf.mxu0  ;;  %v358_v13 = vpop.f32.mrf.mxu1 }
  0xfd   : > { %399 = vst [vmem:[%s964_s19 + $0x70] sm:$0xff] %v293_v12 }
  0xfe   : > { %400 = vst [vmem:[%s964_s19 + $0x78] sm:$0xff] %v358_v13 }
 0x100   : > { %v317_v14 = vpop.f32.mrf.mxu2  ;;  %v382_v15 = vpop.f32.mrf.mxu3 }
 0x101   : > { %415 = vst [vmem:[%s964_s19 + $0xf0] sm:$0xff] %v317_v14 }
 0x102   : > { %416 = vst [vmem:[%s964_s19 + $0xf8] sm:$0xff] %v382_v15 }
 0x103   : > { %751 = shalt.err (!%p748_p0)
}
 0x104   : > { %s817_s30 = smov 256   ;;  %s818_s7 = smov 16  }
 0x105   : > { %591 = dma.vmem_to_hbm [thread:$0]  (%p913_p5), %s434_s21, 4096, %s436_s22, %s418_s12, %s817_s30, %s817_s30, %s818_s7  }
 0x106 PF: > { %s450_s15 = sand.u32 1, %s790_s9   ;;  %p602_p3 = pnand %p536_p11, %p883_p6 }
 0x107   : > { %s451_s17 = scalar_lea.sflag [#allocation4], %s450_s15 }
 0x108   : > { %p603_p7 = pneg %p602_p3 }
 0x10a   : > { %785 = dma.done.wait (%p603_p7), %s451_s17, 4096  }
 0x10b   : > { %787 = vsyncadd (%p603_p7), %s451_s17, 4294963200  ;;  %s19_s14 = sadd.s32 1, %s810_s14   ;;  %s1047_s9 = smov %s794_s10 }
 0x10c   : > { %p16_p9 = scmp.ge.s32.totalorder %s19_s14, 4   ;;  %s1048_s10 = smov %s798_s11 }
 0x10d   : > { %s1049_s11 = smov %s922_s8  ;;  %s1050_s12 = smov %s806_s13 }
 0x10e   : > { %s1051_s13 = smov %s1053_s29  ;;  %18 = sbr.rel (!%p16_p9) target bundleno = 7 (0x7), region = 78 }
 0x113   :  { %457 = vsyncpa [#allocation3], 1 }
 0x114   :  { %459 = vsyncpa [#allocation3 + $0x1], 1 }
 0x115   :  { %460 = vsyncpa [#allocation6], 1 }
 0x116   :  { %461 = vsyncpa [#allocation4], 1 }
 0x117   :  { %463 = vsyncpa [#allocation4 + $0x1], 1 }

</bundles_post_ra>
